<compile_context>
chip_gen: v7x
topology: tpu7x:2x2x1
jax: 0.10.0
libtpu: 0.0.40
codegen_flags: <defaults>
</compile_context>

<pallas_src>
import functools

import jax
import jax.numpy as jnp
from jax import lax
from jax.experimental import pallas as pl
from jax.experimental.pallas import tpu as pltpu


# ----------------------------------------------------------------------------
# Pallas kernel: bidirectional LSTM, zero initial (h, c).
# Fused gate layout (8H columns): [i_f,i_b | f_f,f_b | o_f,o_b | g_f,g_b].
# ----------------------------------------------------------------------------
def bilstm_kernel(x_ref, wx_ref, b_ref, whh_ref, o_ref, gx_ref, *, S, B, H):
    # --- hoisted input projection: ONE big MXU matmul for both directions ---
    x = x_ref[...]                                            # (S*B, D) bf16
    gx_ref[...] = (jnp.dot(x, wx_ref[...],
                           preferred_element_type=jnp.float32)
                   + b_ref[...])                              # (S*B, 8H) f32

    # loop-invariant values hoisted out of the recurrence
    whh = whh_ref[...]                                        # (2H, 8H) bf16
    col = lax.broadcasted_iota(jnp.int32, (B, 8 * H), 1)
    fwd_mask = (col % (2 * H)) < H         # True on forward-direction columns

    # TODO(synk): for production widths pad H to a multiple of 128 so the
    # per-step o_ref half-writes and the (B, 6H)/(B, 2H) gate slabs are
    # lane-dense unmasked ops; at the demo H=16 they are sub-vreg.
    # TODO(synk): for H >= 128 drop the zero-padded fused W_hh below and do
    # two per-direction (B,H)x(H,4H) recurrent matmuls (per-direction gate
    # order [i,f,o|g]) — the fused form doubles MXU work at production H.
    # TODO(synk): v7x production path — grid=(2, S_chunks) with
    # dimension_semantics=("parallel","arbitrary"): directions on the two
    # TensorCores, S chunked with h/c carried in scratch and the x chunk DMA
    # double/triple buffered (pl.Buffered(2-3)).

    def step(t, carry):
        h_bf, c = carry                                       # (B,2H) bf16/f32
        rt = S - 1 - t
        row_f = pl.multiple_of(t * B, B)
        row_b = pl.multiple_of(rt * B, B)

        # full-width (8H) loads; select fwd columns from time t, bwd from S-1-t
        gx_f = gx_ref[pl.ds(row_f, B), :]
        gx_b = gx_ref[pl.ds(row_b, B), :]
        gh = jnp.dot(h_bf, whh, preferred_element_type=jnp.float32)  # (B, 8H)
        g = jnp.where(fwd_mask, gx_f, gx_b) + gh

        # ONE sigmoid over (B, 6H) and ONE tanh over (B, 2H) per step
        sg = jax.nn.sigmoid(g[:, :6 * H])
        gg = jnp.tanh(g[:, 6 * H:])
        i_g = sg[:, :2 * H]
        f_g = sg[:, 2 * H:4 * H]
        o_g = sg[:, 4 * H:6 * H]

        c_new = f_g * c + i_g * gg                            # (B, 2H) f32
        h_new = o_g * jnp.tanh(c_new)                         # (B, 2H) f32

        # per-step output stores: fwd hidden at time t, bwd hidden at S-1-t
        o_ref[pl.ds(row_f, B), :H] = h_new[:, :H]
        o_ref[pl.ds(row_b, B), H:] = h_new[:, H:]

        # bf16 shadow of h feeds the next step's MXU; c stays f32 (v5e has no
        # bf16 VPU/EUP and the cell state is the precision-critical carry)
        return h_new.astype(jnp.bfloat16), c_new

    h0 = jnp.zeros((B, 2 * H), jnp.bfloat16)
    c0 = jnp.zeros((B, 2 * H), jnp.float32)
    # full unroll for short demo S; cap the unroll factor for long sequences
    unroll = S if S <= 16 else 4
    lax.fori_loop(0, S, step, (h0, c0), unroll=unroll)


# ----------------------------------------------------------------------------
# Weight fusion / gate-column permutation (done once, at trace time)
# ----------------------------------------------------------------------------
def _fuse_lstm_weights(params, H):
    """Source per-direction gate order is (i, f, g, o) over 4H columns.
    Target fused 8H layout: [i_f,i_b | f_f,f_b | o_f,o_b | g_f,g_b]."""
    def perm(wf, wb):
        def gate(w, k):
            return w[..., k * H:(k + 1) * H]
        return jnp.concatenate(
            [gate(wf, 0), gate(wb, 0),      # i
             gate(wf, 1), gate(wb, 1),      # f
             gate(wf, 3), gate(wb, 3),      # o
             gate(wf, 2), gate(wb, 2)],     # g
            axis=-1)

    wx = perm(params["wif"], params["wib"])                   # (D, 8H)
    b = perm(params["bf"], params["bb"])                      # (1, 8H)
    zf = jnp.zeros_like(params["whf"])
    zb = jnp.zeros_like(params["whb"])
    whh = jnp.concatenate([perm(params["whf"], zb),           # h_f rows
                           perm(zf, params["whb"])], axis=0)  # h_b rows
    return wx, b, whh


def bilstm_pallas(x_bsd, params):
    """x_bsd: (B, S, D) float32 -> time-major hidden (S, B, 2H), H = D // 2."""
    B, S, D = x_bsd.shape
    H = D // 2
    B_pad = max(8, ((B + 7) // 8) * 8)      # sublane alignment

    # cast to bf16 BEFORE the transpose (half the transpose bytes), then pad
    x = jnp.transpose(x_bsd.astype(jnp.bfloat16), (1, 0, 2))  # (S, B, D)
    if B_pad != B:
        x = jnp.pad(x, ((0, 0), (0, B_pad - B), (0, 0)))
    x_flat = x.reshape(S * B_pad, D)

    wx, b, whh = _fuse_lstm_weights(params, H)

    # TODO(synk): for production S*B, chunk S on an "arbitrary" grid axis (gx
    # computed per chunk, h/c carried in scratch) and tune vmem_limit_bytes
    # per chip (<=~56 MiB on v7x, up to ~112 MiB on v5e/v6e); at demo sizes
    # everything is resident in well under the default scoped VMEM.
    out = pl.pallas_call(
        functools.partial(bilstm_kernel, S=S, B=B_pad, H=H),
        out_shape=jax.ShapeDtypeStruct((S * B_pad, 2 * H), jnp.float32),
        in_specs=[pl.BlockSpec(memory_space=pltpu.MemorySpace.VMEM)] * 4,
        out_specs=pl.BlockSpec(memory_space=pltpu.MemorySpace.VMEM),
        scratch_shapes=[
            pltpu.VMEM((S * B_pad, 8 * H), jnp.float32),      # fused gx
        ],
        compiler_params=pltpu.CompilerParams(
            vmem_limit_bytes=32 * 1024 * 1024),
    )(x_flat,
      wx.astype(jnp.bfloat16),
      b.astype(jnp.float32),
      whh.astype(jnp.bfloat16))

    # time-major (S, B, 2H); padded batch rows sliced off here and never read
    return out.reshape(S, B_pad, 2 * H)[:, :B, :]


# ----------------------------------------------------------------------------
# RnnEncoder.forward
# ----------------------------------------------------------------------------
def rnn_encoder_forward(params, tokenid, span, cat, image=None):
    """
    tokenid (B, S, .) int ; span (B, M, 2) int ; cat (B, M, n_cats) [unused]
    returns (out (B, M, d_lang), hidden_all (B, S, d_lang))
    """
    del cat, image
    B, S = tokenid.shape[0], tokenid.shape[1]
    D = params["emb"].shape[1]
    H = D // 2

    ids = tokenid[..., 0] if tokenid.ndim == 3 else tokenid
    # TODO(synk): ELMo char-CNN/biLM has no clean Pallas equivalent; replaced
    # with a deterministic token-embedding lookup of the same output width.
    x = params["emb"][ids]                      # (B, S, D)  == input_emb
    # dropout layers: eval mode -> identity

    hidden_tm = bilstm_pallas(x, params)        # (S, B, 2H) time-major

    # span extraction directly from the time-major kernel output (no transpose
    # on this path); matches the per-mention python loop in the module.
    m_mask = span[:, :, 0] != -1
    end_idx = jnp.clip(span[:, :, 1] - 1, 0, S - 1)    # forward hidden at end-1
    start_idx = jnp.clip(span[:, :, 0], 0, S - 1)      # backward hidden at start

    def gather_one(h_s2h, e_i, s_i):            # h_s2h: (S, 2H)
        return jnp.concatenate([h_s2h[e_i, :H], h_s2h[s_i, H:]], axis=-1)

    out = jax.vmap(jax.vmap(gather_one, in_axes=(None, 0, 0)),
                   in_axes=(1, 0, 0))(hidden_tm, end_idx, start_idx)  # (B,M,2H)
    out = jnp.where(m_mask[:, :, None], out, jnp.zeros((), jnp.float32))

    # single transpose only for the public (B, S, 2H) return value
    hidden_all = jnp.transpose(hidden_tm, (1, 0, 2))
    return out, hidden_all


# ----------------------------------------------------------------------------
# Pure-JAX reference LSTM (f32, for verification)
# ----------------------------------------------------------------------------
def _lstm_ref_dir(x_bsd, wih, whh, b, H, reverse):
    B = x_bsd.shape[0]

    def step(carry, x_t):
        h, c = carry
        g = x_t @ wih + h @ whh + b
        i = jax.nn.sigmoid(g[:, :H])
        f = jax.nn.sigmoid(g[:, H:2 * H])
        gg = jnp.tanh(g[:, 2 * H:3 * H])
        o = jax.nn.sigmoid(g[:, 3 * H:])
        c = f * c + i * gg
        h = o * jnp.tanh(c)
        return (h, c), h

    xs = jnp.transpose(x_bsd, (1, 0, 2))
    if reverse:
        xs = xs[::-1]
    _, hs = lax.scan(step, (jnp.zeros((B, H)), jnp.zeros((B, H))), xs)
    if reverse:
        hs = hs[::-1]
    return jnp.transpose(hs, (1, 0, 2))


# ----------------------------------------------------------------------------
# Deterministic parameter construction (mirrors nn.LSTM(D, H, bidirectional))
# ----------------------------------------------------------------------------
def make_params(key, vocab, d_lang):
    H = d_lang // 2
    k = 1.0 / jnp.sqrt(jnp.float32(H))
    ks = jax.random.split(key, 9)

    def u(kk, shape):
        return jax.random.uniform(kk, shape, jnp.float32, -k, k)

    emb = jax.random.normal(ks[0], (vocab, d_lang), jnp.float32) * 0.1
    params = {
        "emb": emb,
        "wif": u(ks[1], (d_lang, 4 * H)),
        "whf": u(ks[2], (H, 4 * H)),
        "bf": (u(ks[3], (1, 4 * H)) + u(ks[4], (1, 4 * H))),  # b_ih + b_hh
        "wib": u(ks[5], (d_lang, 4 * H)),
        "whb": u(ks[6], (H, 4 * H)),
        "bb": (u(ks[7], (1, 4 * H)) + u(ks[8], (1, 4 * H))),
    }
    return params


if __name__ == "__main__":
    B, S, D = 2, 8, 32          # batch, seqlen, d_lang
    H = D // 2                  # d_hidden
    M, NCATS, VOCAB = 4, 3, 50  # max_n_mentions, n_cats, vocab size

    root = jax.random.PRNGKey(0)
    k_par, k_tok, k_cat = jax.random.split(root, 3)

    params = make_params(k_par, VOCAB, D)
    tokenid = jax.random.randint(k_tok, (B, S, 5), 1, VOCAB)          # (B, S, .)
    span = jnp.array([[[0, 3], [2, 5], [-1, -1], [5, 8]],
                      [[1, 4], [-1, -1], [3, 7], [-1, -1]]], jnp.int32)  # (B, M, 2)
    cat = jax.random.uniform(k_cat, (B, M, NCATS), jnp.float32)       # unused in forward

    out, hidden_all = jax.jit(rnn_encoder_forward)(params, tokenid, span, cat)
    out = jax.block_until_ready(out)
    hidden_all = jax.block_until_ready(hidden_all)

    assert out.shape == (B, M, D)
    assert hidden_all.shape == (B, S, D)

    # reference check against a pure-JAX f32 bidirectional LSTM
    # (kernel uses bf16 matmul inputs / bf16 h shadow with f32 accumulate and
    # f32 cell state -> looser tolerance; drift grows slowly with S)
    ids = tokenid[..., 0]
    x = params["emb"][ids]
    ref_f = _lstm_ref_dir(x, params["wif"], params["whf"], params["bf"][0], H, False)
    ref_b = _lstm_ref_dir(x, params["wib"], params["whb"], params["bb"][0], H, True)
    ref_hidden = jnp.concatenate([ref_f, ref_b], axis=-1)
    assert jnp.allclose(hidden_all, ref_hidden, atol=2e-2, rtol=2e-2), "LSTM mismatch"

    # masked mentions must be zero
    assert float(jnp.abs(out[0, 2]).max()) == 0.0
    assert float(jnp.abs(out[1, 1]).max()) == 0.0

    # unmasked mentions must match the reference span gather
    ref_out00 = jnp.concatenate([ref_hidden[0, 2, :H], ref_hidden[0, 0, H:]])
    assert jnp.allclose(out[0, 0], ref_out00, atol=2e-2, rtol=2e-2), "span mismatch"

    print("KERNEL_OK")
</pallas_src>

<mosaic_0001>
module attributes {stable_mosaic.version = 11 : i64} {
  func.func @bilstm_kernel(%arg0: memref<64x32xbf16, #tpu.memory_space<vmem>>, %arg1: memref<32x128xbf16, #tpu.memory_space<vmem>>, %arg2: memref<1x128xf32, #tpu.memory_space<vmem>>, %arg3: memref<32x128xbf16, #tpu.memory_space<vmem>>, %arg4: memref<64x32xf32, #tpu.memory_space<vmem>>, %arg5: memref<64x128xf32, #tpu.memory_space<vmem>>) attributes {dimension_semantics = [], scalar_prefetch = 0 : i64, scratch_operands = 1 : i64, tpu.core_type = #tpu.core_type<tc>} {
    %c0 = arith.constant 0 : index
    %c0_0 = arith.constant 0 : index
    %0 = vector.load %arg0[%c0, %c0_0] : memref<64x32xbf16, #tpu.memory_space<vmem>>, vector<64x32xbf16>
    %c0_1 = arith.constant 0 : index
    %c0_2 = arith.constant 0 : index
    %1 = vector.load %arg1[%c0_1, %c0_2] : memref<32x128xbf16, #tpu.memory_space<vmem>>, vector<32x128xbf16>
    %cst = arith.constant dense<0.000000e+00> : vector<64x128xf32>
    %2 = tpu.matmul %0, %1, %cst {dimension_numbers = #tpu.dot_dimension_numbers<[1], [0], [0], [1], [0, 0, 1, 1], [], []>} : vector<64x32xbf16>, vector<32x128xbf16>, vector<64x128xf32> -> vector<64x128xf32>
    %c0_3 = arith.constant 0 : index
    %c0_4 = arith.constant 0 : index
    %3 = vector.load %arg2[%c0_3, %c0_4] : memref<1x128xf32, #tpu.memory_space<vmem>>, vector<1x128xf32>
    %4 = vector.broadcast %3 : vector<1x128xf32> to vector<64x128xf32>
    %5 = arith.addf %2, %4 : vector<64x128xf32>
    %c0_5 = arith.constant 0 : index
    %c0_6 = arith.constant 0 : index
    %6 = vector.load %arg5[%c0_5, %c0_6] : memref<64x128xf32, #tpu.memory_space<vmem>>, vector<64x128xf32>
    tpu.vector_store %arg5[%c0_5, %c0_6], %5 {strides = array<i32>} : memref<64x128xf32, #tpu.memory_space<vmem>>, vector<64x128xf32>,
    %c0_7 = arith.constant 0 : index
    %c0_8 = arith.constant 0 : index
    %7 = vector.load %arg3[%c0_7, %c0_8] : memref<32x128xbf16, #tpu.memory_space<vmem>>, vector<32x128xbf16>
    %8 = tpu.iota {dimensions = array<i32: 1>} : vector<8x128xi32>
    %c32_i32 = arith.constant 32 : i32
    %c0_i32 = arith.constant 0 : i32
    %9 = arith.cmpi eq, %c32_i32, %c0_i32 : i32
    %c1_i32 = arith.constant 1 : i32
    %10 = arith.select %9, %c1_i32, %c32_i32 : i32
    %11 = vector.broadcast %10 : i32 to vector<8x128xi32>
    %12 = arith.remsi %8, %11 : vector<8x128xi32>
    %c0_i32_9 = arith.constant 0 : i32
    %13 = vector.broadcast %c0_i32_9 : i32 to vector<8x128xi32>
    %14 = arith.cmpi ne, %12, %13 : vector<8x128xi32>
    %c0_i32_10 = arith.constant 0 : i32
    %15 = vector.broadcast %c0_i32_10 : i32 to vector<8x128xi32>
    %16 = arith.cmpi slt, %12, %15 : vector<8x128xi32>
    %c0_i32_11 = arith.constant 0 : i32
    %17 = arith.cmpi slt, %10, %c0_i32_11 : i32
    %18 = vector.broadcast %17 : i1 to vector<8x128xi1>
    %19 = vector.broadcast %18 : vector<8x128xi1> to vector<8x128xi1>
    %20 = arith.xori %16, %19 : vector<8x128xi1>
    %21 = arith.andi %20, %14 : vector<8x128xi1>
    %22 = vector.broadcast %10 : i32 to vector<8x128xi32>
    %23 = arith.addi %12, %22 : vector<8x128xi32>
    %24 = arith.select %21, %23, %12 : vector<8x128xi1>, vector<8x128xi32>
    %c16_i32 = arith.constant 16 : i32
    %25 = vector.broadcast %c16_i32 : i32 to vector<8x128xi32>
    %26 = arith.cmpi slt, %24, %25 : vector<8x128xi32>
    %cst_12 = arith.constant 0.000000e+00 : bf16
    %27 = vector.broadcast %cst_12 : bf16 to vector<8x32xbf16>
    %cst_13 = arith.constant 0.000000e+00 : f32
    %28 = vector.broadcast %cst_13 : f32 to vector<8x32xf32>
    %c0_i32_14 = arith.constant 0 : i32
    %c7_i32 = arith.constant 7 : i32
    %29 = arith.subi %c7_i32, %c0_i32_14 : i32
    %c8_i32 = arith.constant 8 : i32
    %30 = arith.muli %c0_i32_14, %c8_i32 : i32
    %31 = tpu.assume_multiple %30, 8 : i32
    %c8_i32_15 = arith.constant 8 : i32
    %32 = arith.muli %29, %c8_i32_15 : i32
    %33 = tpu.assume_multiple %32, 8 : i32
    %34 = arith.index_cast %31 : i32 to index
    %c0_16 = arith.constant 0 : index
    %35 = vector.load %arg5[%34, %c0_16] : memref<64x128xf32, #tpu.memory_space<vmem>>, vector<8x128xf32>
    %36 = arith.index_cast %33 : i32 to index
    %c0_17 = arith.constant 0 : index
    %37 = vector.load %arg5[%36, %c0_17] : memref<64x128xf32, #tpu.memory_space<vmem>>, vector<8x128xf32>
    %cst_18 = arith.constant dense<0.000000e+00> : vector<8x128xf32>
    %38 = tpu.matmul %27, %7, %cst_18 {dimension_numbers = #tpu.dot_dimension_numbers<[1], [0], [0], [1], [0, 0, 1, 1], [], []>} : vector<8x32xbf16>, vector<32x128xbf16>, vector<8x128xf32> -> vector<8x128xf32>
    %39 = arith.select %26, %35, %37 : vector<8x128xi1>, vector<8x128xf32>
    %40 = arith.addf %39, %38 : vector<8x128xf32>
    %41 = vector.extract_strided_slice %40 {offsets = [0, 0], sizes = [8, 96], strides = [1, 1]} : vector<8x128xf32> to vector<8x96xf32>
    %42 = arith.negf %41 : vector<8x96xf32>
    %43 = math.exp %42 : vector<8x96xf32>
    %cst_19 = arith.constant 1.000000e+00 : f32
    %44 = vector.broadcast %cst_19 : f32 to vector<8x96xf32>
    %45 = arith.addf %44, %43 : vector<8x96xf32>
    %46 = arith.divf %44, %45 : vector<8x96xf32>
    %47 = vector.extract_strided_slice %40 {offsets = [0, 96], sizes = [8, 32], strides = [1, 1]} : vector<8x128xf32> to vector<8x32xf32>
    %48 = math.tanh %47 : vector<8x32xf32>
    %49 = vector.extract_strided_slice %46 {offsets = [0, 0], sizes = [8, 32], strides = [1, 1]} : vector<8x96xf32> to vector<8x32xf32>
    %50 = vector.extract_strided_slice %46 {offsets = [0, 32], sizes = [8, 32], strides = [1, 1]} : vector<8x96xf32> to vector<8x32xf32>
    %51 = vector.extract_strided_slice %46 {offsets = [0, 64], sizes = [8, 32], strides = [1, 1]} : vector<8x96xf32> to vector<8x32xf32>
    %52 = arith.mulf %50, %28 : vector<8x32xf32>
    %53 = arith.mulf %49, %48 : vector<8x32xf32>
    %54 = arith.addf %52, %53 : vector<8x32xf32>
    %55 = math.tanh %54 : vector<8x32xf32>
    %56 = arith.mulf %51, %55 : vector<8x32xf32>
    %57 = vector.extract_strided_slice %56 {offsets = [0, 0], sizes = [8, 16], strides = [1, 1]} : vector<8x32xf32> to vector<8x16xf32>
    %58 = arith.index_cast %31 : i32 to index
    %c0_20 = arith.constant 0 : index
    %59 = vector.load %arg4[%58, %c0_20] : memref<64x32xf32, #tpu.memory_space<vmem>>, vector<8x16xf32>
    tpu.vector_store %arg4[%58, %c0_20], %57 {strides = array<i32>} : memref<64x32xf32, #tpu.memory_space<vmem>>, vector<8x16xf32>,
    %60 = vector.extract_strided_slice %56 {offsets = [0, 16], sizes = [8, 16], strides = [1, 1]} : vector<8x32xf32> to vector<8x16xf32>
    %61 = arith.index_cast %33 : i32 to index
    %c16 = arith.constant 16 : index
    %62 = vector.load %arg4[%61, %c16] : memref<64x32xf32, #tpu.memory_space<vmem>>, vector<8x16xf32>
    tpu.vector_store %arg4[%61, %c16], %60 {strides = array<i32>} : memref<64x32xf32, #tpu.memory_space<vmem>>, vector<8x16xf32>,
    %63 = arith.truncf %56 : vector<8x32xf32> to vector<8x32xbf16>
    %c1_i32_21 = arith.constant 1 : i32
    %c7_i32_22 = arith.constant 7 : i32
    %64 = arith.subi %c7_i32_22, %c1_i32_21 : i32
    %c8_i32_23 = arith.constant 8 : i32
    %65 = arith.muli %c1_i32_21, %c8_i32_23 : i32
    %66 = tpu.assume_multiple %65, 8 : i32
    %c8_i32_24 = arith.constant 8 : i32
    %67 = arith.muli %64, %c8_i32_24 : i32
    %68 = tpu.assume_multiple %67, 8 : i32
    %69 = arith.index_cast %66 : i32 to index
    %c0_25 = arith.constant 0 : index
    %70 = vector.load %arg5[%69, %c0_25] : memref<64x128xf32, #tpu.memory_space<vmem>>, vector<8x128xf32>
    %71 = arith.index_cast %68 : i32 to index
    %c0_26 = arith.constant 0 : index
    %72 = vector.load %arg5[%71, %c0_26] : memref<64x128xf32, #tpu.memory_space<vmem>>, vector<8x128xf32>
    %cst_27 = arith.constant dense<0.000000e+00> : vector<8x128xf32>
    %73 = tpu.matmul %63, %7, %cst_27 {dimension_numbers = #tpu.dot_dimension_numbers<[1], [0], [0], [1], [0, 0, 1, 1], [], []>} : vector<8x32xbf16>, vector<32x128xbf16>, vector<8x128xf32> -> vector<8x128xf32>
    %74 = arith.select %26, %70, %72 : vector<8x128xi1>, vector<8x128xf32>
    %75 = arith.addf %74, %73 : vector<8x128xf32>
    %76 = vector.extract_strided_slice %75 {offsets = [0, 0], sizes = [8, 96], strides = [1, 1]} : vector<8x128xf32> to vector<8x96xf32>
    %77 = arith.negf %76 : vector<8x96xf32>
    %78 = math.exp %77 : vector<8x96xf32>
    %cst_28 = arith.constant 1.000000e+00 : f32
    %79 = vector.broadcast %cst_28 : f32 to vector<8x96xf32>
    %80 = arith.addf %79, %78 : vector<8x96xf32>
    %81 = arith.divf %79, %80 : vector<8x96xf32>
    %82 = vector.extract_strided_slice %75 {offsets = [0, 96], sizes = [8, 32], strides = [1, 1]} : vector<8x128xf32> to vector<8x32xf32>
    %83 = math.tanh %82 : vector<8x32xf32>
    %84 = vector.extract_strided_slice %81 {offsets = [0, 0], sizes = [8, 32], strides = [1, 1]} : vector<8x96xf32> to vector<8x32xf32>
    %85 = vector.extract_strided_slice %81 {offsets = [0, 32], sizes = [8, 32], strides = [1, 1]} : vector<8x96xf32> to vector<8x32xf32>
    %86 = vector.extract_strided_slice %81 {offsets = [0, 64], sizes = [8, 32], strides = [1, 1]} : vector<8x96xf32> to vector<8x32xf32>
    %87 = arith.mulf %85, %54 : vector<8x32xf32>
    %88 = arith.mulf %84, %83 : vector<8x32xf32>
    %89 = arith.addf %87, %88 : vector<8x32xf32>
    %90 = math.tanh %89 : vector<8x32xf32>
    %91 = arith.mulf %86, %90 : vector<8x32xf32>
    %92 = vector.extract_strided_slice %91 {offsets = [0, 0], sizes = [8, 16], strides = [1, 1]} : vector<8x32xf32> to vector<8x16xf32>
    %93 = arith.index_cast %66 : i32 to index
    %c0_29 = arith.constant 0 : index
    %94 = vector.load %arg4[%93, %c0_29] : memref<64x32xf32, #tpu.memory_space<vmem>>, vector<8x16xf32>
    tpu.vector_store %arg4[%93, %c0_29], %92 {strides = array<i32>} : memref<64x32xf32, #tpu.memory_space<vmem>>, vector<8x16xf32>,
    %95 = vector.extract_strided_slice %91 {offsets = [0, 16], sizes = [8, 16], strides = [1, 1]} : vector<8x32xf32> to vector<8x16xf32>
    %96 = arith.index_cast %68 : i32 to index
    %c16_30 = arith.constant 16 : index
    %97 = vector.load %arg4[%96, %c16_30] : memref<64x32xf32, #tpu.memory_space<vmem>>, vector<8x16xf32>
    tpu.vector_store %arg4[%96, %c16_30], %95 {strides = array<i32>} : memref<64x32xf32, #tpu.memory_space<vmem>>, vector<8x16xf32>,
    %98 = arith.truncf %91 : vector<8x32xf32> to vector<8x32xbf16>
    %c2_i32 = arith.constant 2 : i32
    %c7_i32_31 = arith.constant 7 : i32
    %99 = arith.subi %c7_i32_31, %c2_i32 : i32
    %c8_i32_32 = arith.constant 8 : i32
    %100 = arith.muli %c2_i32, %c8_i32_32 : i32
    %101 = tpu.assume_multiple %100, 8 : i32
    %c8_i32_33 = arith.constant 8 : i32
    %102 = arith.muli %99, %c8_i32_33 : i32
    %103 = tpu.assume_multiple %102, 8 : i32
    %104 = arith.index_cast %101 : i32 to index
    %c0_34 = arith.constant 0 : index
    %105 = vector.load %arg5[%104, %c0_34] : memref<64x128xf32, #tpu.memory_space<vmem>>, vector<8x128xf32>
    %106 = arith.index_cast %103 : i32 to index
    %c0_35 = arith.constant 0 : index
    %107 = vector.load %arg5[%106, %c0_35] : memref<64x128xf32, #tpu.memory_space<vmem>>, vector<8x128xf32>
    %cst_36 = arith.constant dense<0.000000e+00> : vector<8x128xf32>
    %108 = tpu.matmul %98, %7, %cst_36 {dimension_numbers = #tpu.dot_dimension_numbers<[1], [0], [0], [1], [0, 0, 1, 1], [], []>} : vector<8x32xbf16>, vector<32x128xbf16>, vector<8x128xf32> -> vector<8x128xf32>
    %109 = arith.select %26, %105, %107 : vector<8x128xi1>, vector<8x128xf32>
    %110 = arith.addf %109, %108 : vector<8x128xf32>
    %111 = vector.extract_strided_slice %110 {offsets = [0, 0], sizes = [8, 96], strides = [1, 1]} : vector<8x128xf32> to vector<8x96xf32>
    %112 = arith.negf %111 : vector<8x96xf32>
    %113 = math.exp %112 : vector<8x96xf32>
    %cst_37 = arith.constant 1.000000e+00 : f32
    %114 = vector.broadcast %cst_37 : f32 to vector<8x96xf32>
    %115 = arith.addf %114, %113 : vector<8x96xf32>
    %116 = arith.divf %114, %115 : vector<8x96xf32>
    %117 = vector.extract_strided_slice %110 {offsets = [0, 96], sizes = [8, 32], strides = [1, 1]} : vector<8x128xf32> to vector<8x32xf32>
    %118 = math.tanh %117 : vector<8x32xf32>
    %119 = vector.extract_strided_slice %116 {offsets = [0, 0], sizes = [8, 32], strides = [1, 1]} : vector<8x96xf32> to vector<8x32xf32>
    %120 = vector.extract_strided_slice %116 {offsets = [0, 32], sizes = [8, 32], strides = [1, 1]} : vector<8x96xf32> to vector<8x32xf32>
    %121 = vector.extract_strided_slice %116 {offsets = [0, 64], sizes = [8, 32], strides = [1, 1]} : vector<8x96xf32> to vector<8x32xf32>
    %122 = arith.mulf %120, %89 : vector<8x32xf32>
    %123 = arith.mulf %119, %118 : vector<8x32xf32>
    %124 = arith.addf %122, %123 : vector<8x32xf32>
    %125 = math.tanh %124 : vector<8x32xf32>
    %126 = arith.mulf %121, %125 : vector<8x32xf32>
    %127 = vector.extract_strided_slice %126 {offsets = [0, 0], sizes = [8, 16], strides = [1, 1]} : vector<8x32xf32> to vector<8x16xf32>
    %128 = arith.index_cast %101 : i32 to index
    %c0_38 = arith.constant 0 : index
    %129 = vector.load %arg4[%128, %c0_38] : memref<64x32xf32, #tpu.memory_space<vmem>>, vector<8x16xf32>
    tpu.vector_store %arg4[%128, %c0_38], %127 {strides = array<i32>} : memref<64x32xf32, #tpu.memory_space<vmem>>, vector<8x16xf32>,
    %130 = vector.extract_strided_slice %126 {offsets = [0, 16], sizes = [8, 16], strides = [1, 1]} : vector<8x32xf32> to vector<8x16xf32>
    %131 = arith.index_cast %103 : i32 to index
    %c16_39 = arith.constant 16 : index
    %132 = vector.load %arg4[%131, %c16_39] : memref<64x32xf32, #tpu.memory_space<vmem>>, vector<8x16xf32>
    tpu.vector_store %arg4[%131, %c16_39], %130 {strides = array<i32>} : memref<64x32xf32, #tpu.memory_space<vmem>>, vector<8x16xf32>,
    %133 = arith.truncf %126 : vector<8x32xf32> to vector<8x32xbf16>
    %c3_i32 = arith.constant 3 : i32
    %c7_i32_40 = arith.constant 7 : i32
    %134 = arith.subi %c7_i32_40, %c3_i32 : i32
    %c8_i32_41 = arith.constant 8 : i32
    %135 = arith.muli %c3_i32, %c8_i32_41 : i32
    %136 = tpu.assume_multiple %135, 8 : i32
    %c8_i32_42 = arith.constant 8 : i32
    %137 = arith.muli %134, %c8_i32_42 : i32
    %138 = tpu.assume_multiple %137, 8 : i32
    %139 = arith.index_cast %136 : i32 to index
    %c0_43 = arith.constant 0 : index
    %140 = vector.load %arg5[%139, %c0_43] : memref<64x128xf32, #tpu.memory_space<vmem>>, vector<8x128xf32>
    %141 = arith.index_cast %138 : i32 to index
    %c0_44 = arith.constant 0 : index
    %142 = vector.load %arg5[%141, %c0_44] : memref<64x128xf32, #tpu.memory_space<vmem>>, vector<8x128xf32>
    %cst_45 = arith.constant dense<0.000000e+00> : vector<8x128xf32>
    %143 = tpu.matmul %133, %7, %cst_45 {dimension_numbers = #tpu.dot_dimension_numbers<[1], [0], [0], [1], [0, 0, 1, 1], [], []>} : vector<8x32xbf16>, vector<32x128xbf16>, vector<8x128xf32> -> vector<8x128xf32>
    %144 = arith.select %26, %140, %142 : vector<8x128xi1>, vector<8x128xf32>
    %145 = arith.addf %144, %143 : vector<8x128xf32>
    %146 = vector.extract_strided_slice %145 {offsets = [0, 0], sizes = [8, 96], strides = [1, 1]} : vector<8x128xf32> to vector<8x96xf32>
    %147 = arith.negf %146 : vector<8x96xf32>
    %148 = math.exp %147 : vector<8x96xf32>
    %cst_46 = arith.constant 1.000000e+00 : f32
    %149 = vector.broadcast %cst_46 : f32 to vector<8x96xf32>
    %150 = arith.addf %149, %148 : vector<8x96xf32>
    %151 = arith.divf %149, %150 : vector<8x96xf32>
    %152 = vector.extract_strided_slice %145 {offsets = [0, 96], sizes = [8, 32], strides = [1, 1]} : vector<8x128xf32> to vector<8x32xf32>
    %153 = math.tanh %152 : vector<8x32xf32>
    %154 = vector.extract_strided_slice %151 {offsets = [0, 0], sizes = [8, 32], strides = [1, 1]} : vector<8x96xf32> to vector<8x32xf32>
    %155 = vector.extract_strided_slice %151 {offsets = [0, 32], sizes = [8, 32], strides = [1, 1]} : vector<8x96xf32> to vector<8x32xf32>
    %156 = vector.extract_strided_slice %151 {offsets = [0, 64], sizes = [8, 32], strides = [1, 1]} : vector<8x96xf32> to vector<8x32xf32>
    %157 = arith.mulf %155, %124 : vector<8x32xf32>
    %158 = arith.mulf %154, %153 : vector<8x32xf32>
    %159 = arith.addf %157, %158 : vector<8x32xf32>
    %160 = math.tanh %159 : vector<8x32xf32>
    %161 = arith.mulf %156, %160 : vector<8x32xf32>
    %162 = vector.extract_strided_slice %161 {offsets = [0, 0], sizes = [8, 16], strides = [1, 1]} : vector<8x32xf32> to vector<8x16xf32>
    %163 = arith.index_cast %136 : i32 to index
    %c0_47 = arith.constant 0 : index
    %164 = vector.load %arg4[%163, %c0_47] : memref<64x32xf32, #tpu.memory_space<vmem>>, vector<8x16xf32>
    tpu.vector_store %arg4[%163, %c0_47], %162 {strides = array<i32>} : memref<64x32xf32, #tpu.memory_space<vmem>>, vector<8x16xf32>,
    %165 = vector.extract_strided_slice %161 {offsets = [0, 16], sizes = [8, 16], strides = [1, 1]} : vector<8x32xf32> to vector<8x16xf32>
    %166 = arith.index_cast %138 : i32 to index
    %c16_48 = arith.constant 16 : index
    %167 = vector.load %arg4[%166, %c16_48] : memref<64x32xf32, #tpu.memory_space<vmem>>, vector<8x16xf32>
    tpu.vector_store %arg4[%166, %c16_48], %165 {strides = array<i32>} : memref<64x32xf32, #tpu.memory_space<vmem>>, vector<8x16xf32>,
    %168 = arith.truncf %161 : vector<8x32xf32> to vector<8x32xbf16>
    %c4_i32 = arith.constant 4 : i32
    %c7_i32_49 = arith.constant 7 : i32
    %169 = arith.subi %c7_i32_49, %c4_i32 : i32
    %c8_i32_50 = arith.constant 8 : i32
    %170 = arith.muli %c4_i32, %c8_i32_50 : i32
    %171 = tpu.assume_multiple %170, 8 : i32
    %c8_i32_51 = arith.constant 8 : i32
    %172 = arith.muli %169, %c8_i32_51 : i32
    %173 = tpu.assume_multiple %172, 8 : i32
    %174 = arith.index_cast %171 : i32 to index
    %c0_52 = arith.constant 0 : index
    %175 = vector.load %arg5[%174, %c0_52] : memref<64x128xf32, #tpu.memory_space<vmem>>, vector<8x128xf32>
    %176 = arith.index_cast %173 : i32 to index
    %c0_53 = arith.constant 0 : index
    %177 = vector.load %arg5[%176, %c0_53] : memref<64x128xf32, #tpu.memory_space<vmem>>, vector<8x128xf32>
    %cst_54 = arith.constant dense<0.000000e+00> : vector<8x128xf32>
    %178 = tpu.matmul %168, %7, %cst_54 {dimension_numbers = #tpu.dot_dimension_numbers<[1], [0], [0], [1], [0, 0, 1, 1], [], []>} : vector<8x32xbf16>, vector<32x128xbf16>, vector<8x128xf32> -> vector<8x128xf32>
    %179 = arith.select %26, %175, %177 : vector<8x128xi1>, vector<8x128xf32>
    %180 = arith.addf %179, %178 : vector<8x128xf32>
    %181 = vector.extract_strided_slice %180 {offsets = [0, 0], sizes = [8, 96], strides = [1, 1]} : vector<8x128xf32> to vector<8x96xf32>
    %182 = arith.negf %181 : vector<8x96xf32>
    %183 = math.exp %182 : vector<8x96xf32>
    %cst_55 = arith.constant 1.000000e+00 : f32
    %184 = vector.broadcast %cst_55 : f32 to vector<8x96xf32>
    %185 = arith.addf %184, %183 : vector<8x96xf32>
    %186 = arith.divf %184, %185 : vector<8x96xf32>
    %187 = vector.extract_strided_slice %180 {offsets = [0, 96], sizes = [8, 32], strides = [1, 1]} : vector<8x128xf32> to vector<8x32xf32>
    %188 = math.tanh %187 : vector<8x32xf32>
    %189 = vector.extract_strided_slice %186 {offsets = [0, 0], sizes = [8, 32], strides = [1, 1]} : vector<8x96xf32> to vector<8x32xf32>
    %190 = vector.extract_strided_slice %186 {offsets = [0, 32], sizes = [8, 32], strides = [1, 1]} : vector<8x96xf32> to vector<8x32xf32>
    %191 = vector.extract_strided_slice %186 {offsets = [0, 64], sizes = [8, 32], strides = [1, 1]} : vector<8x96xf32> to vector<8x32xf32>
    %192 = arith.mulf %190, %159 : vector<8x32xf32>
    %193 = arith.mulf %189, %188 : vector<8x32xf32>
    %194 = arith.addf %192, %193 : vector<8x32xf32>
    %195 = math.tanh %194 : vector<8x32xf32>
    %196 = arith.mulf %191, %195 : vector<8x32xf32>
    %197 = vector.extract_strided_slice %196 {offsets = [0, 0], sizes = [8, 16], strides = [1, 1]} : vector<8x32xf32> to vector<8x16xf32>
    %198 = arith.index_cast %171 : i32 to index
    %c0_56 = arith.constant 0 : index
    %199 = vector.load %arg4[%198, %c0_56] : memref<64x32xf32, #tpu.memory_space<vmem>>, vector<8x16xf32>
    tpu.vector_store %arg4[%198, %c0_56], %197 {strides = array<i32>} : memref<64x32xf32, #tpu.memory_space<vmem>>, vector<8x16xf32>,
    %200 = vector.extract_strided_slice %196 {offsets = [0, 16], sizes = [8, 16], strides = [1, 1]} : vector<8x32xf32> to vector<8x16xf32>
    %201 = arith.index_cast %173 : i32 to index
    %c16_57 = arith.constant 16 : index
    %202 = vector.load %arg4[%201, %c16_57] : memref<64x32xf32, #tpu.memory_space<vmem>>, vector<8x16xf32>
    tpu.vector_store %arg4[%201, %c16_57], %200 {strides = array<i32>} : memref<64x32xf32, #tpu.memory_space<vmem>>, vector<8x16xf32>,
    %203 = arith.truncf %196 : vector<8x32xf32> to vector<8x32xbf16>
    %c5_i32 = arith.constant 5 : i32
    %c7_i32_58 = arith.constant 7 : i32
    %204 = arith.subi %c7_i32_58, %c5_i32 : i32
    %c8_i32_59 = arith.constant 8 : i32
    %205 = arith.muli %c5_i32, %c8_i32_59 : i32
    %206 = tpu.assume_multiple %205, 8 : i32
    %c8_i32_60 = arith.constant 8 : i32
    %207 = arith.muli %204, %c8_i32_60 : i32
    %208 = tpu.assume_multiple %207, 8 : i32
    %209 = arith.index_cast %206 : i32 to index
    %c0_61 = arith.constant 0 : index
    %210 = vector.load %arg5[%209, %c0_61] : memref<64x128xf32, #tpu.memory_space<vmem>>, vector<8x128xf32>
    %211 = arith.index_cast %208 : i32 to index
    %c0_62 = arith.constant 0 : index
    %212 = vector.load %arg5[%211, %c0_62] : memref<64x128xf32, #tpu.memory_space<vmem>>, vector<8x128xf32>
    %cst_63 = arith.constant dense<0.000000e+00> : vector<8x128xf32>
    %213 = tpu.matmul %203, %7, %cst_63 {dimension_numbers = #tpu.dot_dimension_numbers<[1], [0], [0], [1], [0, 0, 1, 1], [], []>} : vector<8x32xbf16>, vector<32x128xbf16>, vector<8x128xf32> -> vector<8x128xf32>
    %214 = arith.select %26, %210, %212 : vector<8x128xi1>, vector<8x128xf32>
    %215 = arith.addf %214, %213 : vector<8x128xf32>
    %216 = vector.extract_strided_slice %215 {offsets = [0, 0], sizes = [8, 96], strides = [1, 1]} : vector<8x128xf32> to vector<8x96xf32>
    %217 = arith.negf %216 : vector<8x96xf32>
    %218 = math.exp %217 : vector<8x96xf32>
    %cst_64 = arith.constant 1.000000e+00 : f32
    %219 = vector.broadcast %cst_64 : f32 to vector<8x96xf32>
    %220 = arith.addf %219, %218 : vector<8x96xf32>
    %221 = arith.divf %219, %220 : vector<8x96xf32>
    %222 = vector.extract_strided_slice %215 {offsets = [0, 96], sizes = [8, 32], strides = [1, 1]} : vector<8x128xf32> to vector<8x32xf32>
    %223 = math.tanh %222 : vector<8x32xf32>
    %224 = vector.extract_strided_slice %221 {offsets = [0, 0], sizes = [8, 32], strides = [1, 1]} : vector<8x96xf32> to vector<8x32xf32>
    %225 = vector.extract_strided_slice %221 {offsets = [0, 32], sizes = [8, 32], strides = [1, 1]} : vector<8x96xf32> to vector<8x32xf32>
    %226 = vector.extract_strided_slice %221 {offsets = [0, 64], sizes = [8, 32], strides = [1, 1]} : vector<8x96xf32> to vector<8x32xf32>
    %227 = arith.mulf %225, %194 : vector<8x32xf32>
    %228 = arith.mulf %224, %223 : vector<8x32xf32>
    %229 = arith.addf %227, %228 : vector<8x32xf32>
    %230 = math.tanh %229 : vector<8x32xf32>
    %231 = arith.mulf %226, %230 : vector<8x32xf32>
    %232 = vector.extract_strided_slice %231 {offsets = [0, 0], sizes = [8, 16], strides = [1, 1]} : vector<8x32xf32> to vector<8x16xf32>
    %233 = arith.index_cast %206 : i32 to index
    %c0_65 = arith.constant 0 : index
    %234 = vector.load %arg4[%233, %c0_65] : memref<64x32xf32, #tpu.memory_space<vmem>>, vector<8x16xf32>
    tpu.vector_store %arg4[%233, %c0_65], %232 {strides = array<i32>} : memref<64x32xf32, #tpu.memory_space<vmem>>, vector<8x16xf32>,
    %235 = vector.extract_strided_slice %231 {offsets = [0, 16], sizes = [8, 16], strides = [1, 1]} : vector<8x32xf32> to vector<8x16xf32>
    %236 = arith.index_cast %208 : i32 to index
    %c16_66 = arith.constant 16 : index
    %237 = vector.load %arg4[%236, %c16_66] : memref<64x32xf32, #tpu.memory_space<vmem>>, vector<8x16xf32>
    tpu.vector_store %arg4[%236, %c16_66], %235 {strides = array<i32>} : memref<64x32xf32, #tpu.memory_space<vmem>>, vector<8x16xf32>,
    %238 = arith.truncf %231 : vector<8x32xf32> to vector<8x32xbf16>
    %c6_i32 = arith.constant 6 : i32
    %c7_i32_67 = arith.constant 7 : i32
    %239 = arith.subi %c7_i32_67, %c6_i32 : i32
    %c8_i32_68 = arith.constant 8 : i32
    %240 = arith.muli %c6_i32, %c8_i32_68 : i32
    %241 = tpu.assume_multiple %240, 8 : i32
    %c8_i32_69 = arith.constant 8 : i32
    %242 = arith.muli %239, %c8_i32_69 : i32
    %243 = tpu.assume_multiple %242, 8 : i32
    %244 = arith.index_cast %241 : i32 to index
    %c0_70 = arith.constant 0 : index
    %245 = vector.load %arg5[%244, %c0_70] : memref<64x128xf32, #tpu.memory_space<vmem>>, vector<8x128xf32>
    %246 = arith.index_cast %243 : i32 to index
    %c0_71 = arith.constant 0 : index
    %247 = vector.load %arg5[%246, %c0_71] : memref<64x128xf32, #tpu.memory_space<vmem>>, vector<8x128xf32>
    %cst_72 = arith.constant dense<0.000000e+00> : vector<8x128xf32>
    %248 = tpu.matmul %238, %7, %cst_72 {dimension_numbers = #tpu.dot_dimension_numbers<[1], [0], [0], [1], [0, 0, 1, 1], [], []>} : vector<8x32xbf16>, vector<32x128xbf16>, vector<8x128xf32> -> vector<8x128xf32>
    %249 = arith.select %26, %245, %247 : vector<8x128xi1>, vector<8x128xf32>
    %250 = arith.addf %249, %248 : vector<8x128xf32>
    %251 = vector.extract_strided_slice %250 {offsets = [0, 0], sizes = [8, 96], strides = [1, 1]} : vector<8x128xf32> to vector<8x96xf32>
    %252 = arith.negf %251 : vector<8x96xf32>
    %253 = math.exp %252 : vector<8x96xf32>
    %cst_73 = arith.constant 1.000000e+00 : f32
    %254 = vector.broadcast %cst_73 : f32 to vector<8x96xf32>
    %255 = arith.addf %254, %253 : vector<8x96xf32>
    %256 = arith.divf %254, %255 : vector<8x96xf32>
    %257 = vector.extract_strided_slice %250 {offsets = [0, 96], sizes = [8, 32], strides = [1, 1]} : vector<8x128xf32> to vector<8x32xf32>
    %258 = math.tanh %257 : vector<8x32xf32>
    %259 = vector.extract_strided_slice %256 {offsets = [0, 0], sizes = [8, 32], strides = [1, 1]} : vector<8x96xf32> to vector<8x32xf32>
    %260 = vector.extract_strided_slice %256 {offsets = [0, 32], sizes = [8, 32], strides = [1, 1]} : vector<8x96xf32> to vector<8x32xf32>
    %261 = vector.extract_strided_slice %256 {offsets = [0, 64], sizes = [8, 32], strides = [1, 1]} : vector<8x96xf32> to vector<8x32xf32>
    %262 = arith.mulf %260, %229 : vector<8x32xf32>
    %263 = arith.mulf %259, %258 : vector<8x32xf32>
    %264 = arith.addf %262, %263 : vector<8x32xf32>
    %265 = math.tanh %264 : vector<8x32xf32>
    %266 = arith.mulf %261, %265 : vector<8x32xf32>
    %267 = vector.extract_strided_slice %266 {offsets = [0, 0], sizes = [8, 16], strides = [1, 1]} : vector<8x32xf32> to vector<8x16xf32>
    %268 = arith.index_cast %241 : i32 to index
    %c0_74 = arith.constant 0 : index
    %269 = vector.load %arg4[%268, %c0_74] : memref<64x32xf32, #tpu.memory_space<vmem>>, vector<8x16xf32>
    tpu.vector_store %arg4[%268, %c0_74], %267 {strides = array<i32>} : memref<64x32xf32, #tpu.memory_space<vmem>>, vector<8x16xf32>,
    %270 = vector.extract_strided_slice %266 {offsets = [0, 16], sizes = [8, 16], strides = [1, 1]} : vector<8x32xf32> to vector<8x16xf32>
    %271 = arith.index_cast %243 : i32 to index
    %c16_75 = arith.constant 16 : index
    %272 = vector.load %arg4[%271, %c16_75] : memref<64x32xf32, #tpu.memory_space<vmem>>, vector<8x16xf32>
    tpu.vector_store %arg4[%271, %c16_75], %270 {strides = array<i32>} : memref<64x32xf32, #tpu.memory_space<vmem>>, vector<8x16xf32>,
    %273 = arith.truncf %266 : vector<8x32xf32> to vector<8x32xbf16>
    %c7_i32_76 = arith.constant 7 : i32
    %c7_i32_77 = arith.constant 7 : i32
    %274 = arith.subi %c7_i32_77, %c7_i32_76 : i32
    %c8_i32_78 = arith.constant 8 : i32
    %275 = arith.muli %c7_i32_76, %c8_i32_78 : i32
    %276 = tpu.assume_multiple %275, 8 : i32
    %c8_i32_79 = arith.constant 8 : i32
    %277 = arith.muli %274, %c8_i32_79 : i32
    %278 = tpu.assume_multiple %277, 8 : i32
    %279 = arith.index_cast %276 : i32 to index
    %c0_80 = arith.constant 0 : index
    %280 = vector.load %arg5[%279, %c0_80] : memref<64x128xf32, #tpu.memory_space<vmem>>, vector<8x128xf32>
    %281 = arith.index_cast %278 : i32 to index
    %c0_81 = arith.constant 0 : index
    %282 = vector.load %arg5[%281, %c0_81] : memref<64x128xf32, #tpu.memory_space<vmem>>, vector<8x128xf32>
    %cst_82 = arith.constant dense<0.000000e+00> : vector<8x128xf32>
    %283 = tpu.matmul %273, %7, %cst_82 {dimension_numbers = #tpu.dot_dimension_numbers<[1], [0], [0], [1], [0, 0, 1, 1], [], []>} : vector<8x32xbf16>, vector<32x128xbf16>, vector<8x128xf32> -> vector<8x128xf32>
    %284 = arith.select %26, %280, %282 : vector<8x128xi1>, vector<8x128xf32>
    %285 = arith.addf %284, %283 : vector<8x128xf32>
    %286 = vector.extract_strided_slice %285 {offsets = [0, 0], sizes = [8, 96], strides = [1, 1]} : vector<8x128xf32> to vector<8x96xf32>
    %287 = arith.negf %286 : vector<8x96xf32>
    %288 = math.exp %287 : vector<8x96xf32>
    %cst_83 = arith.constant 1.000000e+00 : f32
    %289 = vector.broadcast %cst_83 : f32 to vector<8x96xf32>
    %290 = arith.addf %289, %288 : vector<8x96xf32>
    %291 = arith.divf %289, %290 : vector<8x96xf32>
    %292 = vector.extract_strided_slice %285 {offsets = [0, 96], sizes = [8, 32], strides = [1, 1]} : vector<8x128xf32> to vector<8x32xf32>
    %293 = math.tanh %292 : vector<8x32xf32>
    %294 = vector.extract_strided_slice %291 {offsets = [0, 0], sizes = [8, 32], strides = [1, 1]} : vector<8x96xf32> to vector<8x32xf32>
    %295 = vector.extract_strided_slice %291 {offsets = [0, 32], sizes = [8, 32], strides = [1, 1]} : vector<8x96xf32> to vector<8x32xf32>
    %296 = vector.extract_strided_slice %291 {offsets = [0, 64], sizes = [8, 32], strides = [1, 1]} : vector<8x96xf32> to vector<8x32xf32>
    %297 = arith.mulf %295, %264 : vector<8x32xf32>
    %298 = arith.mulf %294, %293 : vector<8x32xf32>
    %299 = arith.addf %297, %298 : vector<8x32xf32>
    %300 = math.tanh %299 : vector<8x32xf32>
    %301 = arith.mulf %296, %300 : vector<8x32xf32>
    %302 = vector.extract_strided_slice %301 {offsets = [0, 0], sizes = [8, 16], strides = [1, 1]} : vector<8x32xf32> to vector<8x16xf32>
    %303 = arith.index_cast %276 : i32 to index
    %c0_84 = arith.constant 0 : index
    %304 = vector.load %arg4[%303, %c0_84] : memref<64x32xf32, #tpu.memory_space<vmem>>, vector<8x16xf32>
    tpu.vector_store %arg4[%303, %c0_84], %302 {strides = array<i32>} : memref<64x32xf32, #tpu.memory_space<vmem>>, vector<8x16xf32>,
    %305 = vector.extract_strided_slice %301 {offsets = [0, 16], sizes = [8, 16], strides = [1, 1]} : vector<8x32xf32> to vector<8x16xf32>
    %306 = arith.index_cast %278 : i32 to index
    %c16_85 = arith.constant 16 : index
    %307 = vector.load %arg4[%306, %c16_85] : memref<64x32xf32, #tpu.memory_space<vmem>>, vector<8x16xf32>
    tpu.vector_store %arg4[%306, %c16_85], %305 {strides = array<i32>} : memref<64x32xf32, #tpu.memory_space<vmem>>, vector<8x16xf32>,
    %308 = arith.truncf %301 : vector<8x32xf32> to vector<8x32xbf16>
    %c8_i32_86 = arith.constant 8 : i32
    return
  }
}

</mosaic_0001>

<bundles_post_ra>
// kernel: rnn_encoder_forward.1
= control target key start
LH: loop header
LB: loop body
LE: loop exit
PB: predicated region body
PF: predicated region fallthrough
CT: control target
= control target key end

     0   :  { %v1075_v1 = vmov 0.0   ;;  %vm1076_vm0 = vmmov 0   ;;  %vm69_vm1 = vcmask 261120   ;;  %v1077_v8 = vmov 0   ;;  %s1079_s30 = smov 64   ;;  %s1410_s1 = inlined_call_operand.vmem [shape: bf16[32,128], index: 1, kind: input, shape index: {}]   ;;  %s1411_s0 = inlined_call_operand.vmem [shape: bf16[64,32], index: 0, kind: input, shape index: {}]   ;;  %s1412_s3 = inlined_call_operand.vmem [shape: bf16[32,128], index: 3, kind: input, shape index: {}]   ;;  %s1413_s2 = inlined_call_operand.vmem [shape: f32[1,128], index: 2, kind: input, shape index: {}]   ;;  %s1414_s4 = inlined_call_operand.vmem [shape: f32[64,32], index: 4, kind: output, shape index: {}]  }
   0x1   :  { %v1003_v0 = vld [vmem:[%s1410_s1] sm:$0xff]   ;;  %934 = vmatprep.subr.bf16.mxu1 %v1075_v1  ;;  %938 = vmatprep.mubr.msk.bf16.mxu1 %vm1076_vm0, %v1075_v1  ;;  %v1004_v2 = vld [vmem:[%s1410_s1 + $0x8] sm:$0xff]   ;;  %v1008_v7 = vld [vmem:[%s1411_s0 + $0x10] sm:$0xff]   ;;  %v159_v10 = vlaneseq  ;;  %vm262_vm3 = vcmask 130048   ;;  %vm265_vm4 = vcmask 261248  }
   0x2   :  { %922 = vmatprep.subr.bf16.mxu0 %v1003_v0  ;;  %v1005_v3 = vld [vmem:[%s1411_s0] sm:$0xff]   ;;  %v1006_v5 = vld [vmem:[%s1411_s0 + $0x8] sm:$0xff]   ;;  %v1010_v9 = vld [vmem:[%s1411_s0 + $0x18] sm:$0xff]  }
   0x3   :  { %923 = vmatpush3.bf16.msra.mxu0 %v1003_v0  ;;  %926 = vmatprep.mubr.msk.bf16.mxu0 %vm69_vm1, %v1005_v3  ;;  %v1121_v4 = vld [vmem:[%s1412_s3] sm:$0xff]   ;;  %v1130_v6 = vld [vmem:[%s1412_s3 + $0x8] sm:$0xff]   ;;  %v160_v13 = vand.u32 127, %v159_v10 }
   0x4   :  { %924 = vmatprep.subr.bf16.mxu0 %v1004_v2  ;;  %935 = vmatpush3.bf16.msra.mxu1 %v1121_v4  ;;  %v850_v11 = vld [vmem:[%s1413_s2] ss:$0 sm:$0xff]  ;;  %s1078_s2 = smov 32  }
   0x5   :  { %936 = vmatprep.subr.bf16.mxu1 %v1075_v1  ;;  %v165_v21 = vand.u32 31, %v160_v13 }
   0x7   :  { %925 = vmatpush3.bf16.msra.mxu0 %v1004_v2  ;;  %vm1166_vm2 = vcmp.lt.s32.totalorder %v165_v21, 16 }
   0x8   :  { %950 = vmatprep.subr.bf16.mxu0 %v1075_v1  ;;  %937 = vmatpush3.bf16.msra.mxu1 %v1130_v6 }
   0x9   :  { %942 = vmatprep.subr.bf16.mxu1 %v1075_v1 }
   0xa   :  { %927 = vmatmul.mubr.msk.bf16.vlgmr.msra.gmra.mrb[0].mxu0 %vm69_vm1, %v1006_v5 }
   0xb   :  { %930 = vmatprep.mubr.msk.bf16.mxu0 %vm69_vm1, %v1008_v7  ;;  %951 = vmatpush3.bf16.msra.mxu0 %v1121_v4 }
   0xc   :  { %939 = vmatmul.mubr.bf16.vlgmr.msra.gmra.mrb[0].mxu1 %v1077_v8  ;;  %952 = vmatprep.subr.bf16.mxu0 %v1075_v1 }
   0xd   :  { %943 = vmatpush3.bf16.msra.mxu1 %v1121_v4  ;;  %946 = vmatprep.mubr.msk.bf16.mxu1 %vm1076_vm0, %v1075_v1 }
   0xe   :  { %944 = vmatprep.subr.bf16.mxu1 %v1075_v1 }
   0xf   :  { %953 = vmatpush3.bf16.msra.mxu0 %v1130_v6 }
  0x10   :  { %966 = vmatprep.subr.bf16.mxu0 %v1075_v1 }
  0x11   :  { %945 = vmatpush3.bf16.msra.mxu1 %v1130_v6 }
  0x12   :  { %931 = vmatmul.mubr.msk.bf16.gmra.mrb[4].mxu0 %vm69_vm1, %v1010_v9  ;;  %958 = vmatprep.subr.bf16.mxu1 %v1075_v1 }
  0x13   :  { %954 = vmatprep.mubr.msk.bf16.mxu0 %vm1076_vm0, %v1075_v1 }
  0xdd   :  { %v928_v12 = vpop.f32.mrb[0].mxu0 }
  0xde   :  { %v1160_v14 = vadd.f32 %v928_v12, %v850_v11  ;;  %v116_v15 = vpop.f32.mrb[1].mxu0 }
  0xdf   :  { %v929_v16 = vpop.f32.mrb[2].mxu0  ;;  %v226_v19 = vpop.f32.mrb[0].mxu1  ;;  %v1174_v31 = vadd.f32 %v850_v11, %v116_v15 }
  0xe0   :  { %v1162_v17 = vadd.f32 %v929_v16, %v850_v11  ;;  %v119_v18 = vpop.f32.mrb[3].mxu0  ;;  %v940_v22 = vpop.f32.mrb[1].mxu1 }
  0xe1   :  { %v1164_v20 = vadd.f32 %v850_v11, %v119_v18  ;;  %v229_v23 = vpop.f32.mrb[2].mxu1 }
  0xe2   :  { %v941_v24 = vpop.f32.mrb[3].mxu1 }
  0xe5   :  { %v932_v25 = vpop.f32.mrb[4].mxu0 }
  0xe6   :  { %v1170_v27 = vadd.f32 %v932_v25, %v850_v11  ;;  %v132_v28 = vpop.f32.mrb[5].mxu0 }
  0xe7   :  { %v1172_v29 = vadd.f32 %v850_v11, %v132_v28  ;;  %v933_v30 = vpop.f32.mrb[6].mxu0 }
  0xe8   :  { %v1176_v32 = vadd.f32 %v933_v30, %v850_v11  ;;  %v135_v33 = vpop.f32.mrb[7].mxu0  ;;  %v318_v34 = vsel %vm1166_vm2, %v1164_v20, %v1170_v27  ;;  %v733_v35 = vsel %vm1166_vm2, %v1170_v27, %v1164_v20 }
  0xe9   :  { %v1186_v36 = vadd.f32 %v850_v11, %v135_v33  ;;  %v488_v37 = vsel %vm1166_vm2, %v1162_v17, %v1172_v29  ;;  %v571_v38 = vsel %vm1166_vm2, %v1172_v29, %v1162_v17 }
  0xea   :  { %v232_v39 = vsel %vm1166_vm2, %v1174_v31, %v1176_v32  ;;  %v814_v40 = vsel %vm1166_vm2, %v1176_v32, %v1174_v31 }
  0xeb   :  { %v233_v41 = vadd.f32 %v232_v39, %v226_v19  ;;  %v403_v42 = vsel %vm1166_vm2, %v1160_v14, %v1186_v36  ;;  %v652_v43 = vsel %vm1166_vm2, %v1186_v36, %v1160_v14 }
  0xed   :  { %1011 = vtanh.f32 %v233_v41  ;;  %v863_v45 = vmul.f32 -1.442695, %v233_v41 }
  0xef   :  { %1013 = vpow2.f32 %v863_v45 }
  0xf7   :  { %v1012_v44 = vpop.eup %1011 }
  0xf8   :  { %243 = vrot.lane.b32.xlu0 %v1012_v44, %s1078_s2 }
  0xf9   :  { %v1014_v46 = vpop.eup %1013 }
  0xfa   :  { %v237_v47 = vadd.f32 1.0, %v1014_v46 }
  0xfc   :  { %1015 = vrcp.f32 %v237_v47 }
 0x106   :  { %v1016_v48 = vpop.eup %1015 }
 0x107   :  { %v241_v51 = vmul.f32 0.0, %v1016_v48 }
 0x16a   :  { %v244_v49 = vpop.permute.xlu0 %243 }
 0x16b   :  { %v246_v50 = vmul.f32 %v1016_v48, %v244_v49 }
 0x16d   :  { %248 = vrot.lane.b32.xlu0 %v246_v50, %s1078_s2 }
 0x1df   :  { %v249_v52 = vpop.permute.xlu0 %248 }
 0x1e0   :  { %v251_v53 = vadd.f32 %v249_v52, %v241_v51 }
 0x1e2   :  { %1017 = vtanh.f32 %v251_v53 }
 0x1ec   :  { %v1018_v54 = vpop.eup %1017 }
 0x1ed   :  { %254 = vrot.lane.b32.xlu1 %v1018_v54, %s1078_s2 }
 0x25f   :  { %v255_v55 = vpop.permute.xlu1 %254 }
 0x260   :  { %v1215_v56 = vmul.f32 %v1016_v48, %v255_v55 }
 0x262   :  { %v267_v57 = vpack.c.bf16 %v1215_v56, %v1215_v56 }
 0x264   :  { %273 = vrot.lane.b32.xlu1 %v267_v57, %s1079_s30 }
 0x2d6   :  { %v274_v58 = vpop.permute.xlu1 %273 }
 0x2d7   :  { %947 = vmatmul.mubr.msk.bf16.vlgmr.msra.gmra.mrb[4].mxu1 %vm69_vm1, %v274_v58 }
 0x2d8   :  { %959 = vmatpush3.bf16.msra.mxu1 %v1121_v4  ;;  %962 = vmatprep.mubr.msk.bf16.mxu1 %vm1076_vm0, %v1075_v1 }
 0x2d9   :  { %960 = vmatprep.subr.bf16.mxu1 %v1075_v1 }
 0x2dc   :  { %961 = vmatpush3.bf16.msra.mxu1 %v1130_v6 }
 0x2dd   :  { %974 = vmatprep.subr.bf16.mxu1 %v1075_v1 }
 0x3aa   :  { %v312_v59 = vpop.f32.mrb[4].mxu1 }
 0x3ab   :  { %v319_v60 = vadd.f32 %v318_v34, %v312_v59  ;;  %v948_v61 = vpop.f32.mrb[5].mxu1 }
 0x3ac   :  { %v315_v62 = vpop.f32.mrb[6].mxu1 }
 0x3ad   :  { %1019 = vtanh.f32 %v319_v60  ;;  %v949_v63 = vpop.f32.mrb[7].mxu1  ;;  %v866_v2 = vmul.f32 -1.442695, %v319_v60 }
 0x3af   :  { %1021 = vpow2.f32 %v866_v2 }
 0x3b7   :  { %v1020_v0 = vpop.eup %1019 }
 0x3b8   :  { %329 = vrot.lane.b32.xlu0 %v1020_v0, %s1078_s2 }
 0x3b9   :  { %v1022_v3 = vpop.eup %1021 }
 0x3ba   :  { %v323_v5 = vadd.f32 1.0, %v1022_v3 }
 0x3bc   :  { %1023 = vrcp.f32 %v323_v5 }
 0x3c6   :  { %v1024_v7 = vpop.eup %1023 }
 0x3c7   :  { %v327_v10 = vmul.f32 %v1024_v7, %v251_v53 }
 0x42a   :  { %v330_v8 = vpop.permute.xlu0 %329 }
 0x42b   :  { %v332_v9 = vmul.f32 %v1024_v7, %v330_v8 }
 0x42d   :  { %334 = vrot.lane.b32.xlu1 %v332_v9, %s1078_s2 }
 0x49f   :  { %v335_v11 = vpop.permute.xlu1 %334 }
 0x4a0   :  { %v337_v12 = vadd.f32 %v335_v11, %v327_v10 }
 0x4a2   :  { %1025 = vtanh.f32 %v337_v12 }
 0x4ac   :  { %v1026_v13 = vpop.eup %1025 }
 0x4ad   :  { %340 = vrot.lane.b32.xlu0 %v1026_v13, %s1078_s2 }
 0x51f   :  { %v341_v15 = vpop.permute.xlu0 %340 }
 0x520   :  { %v1230_v16 = vmul.f32 %v1024_v7, %v341_v15 }
 0x522   :  { %v352_v18 = vpack.c.bf16 %v1230_v16, %v1230_v16 }
 0x524   :  { %358 = vrot.lane.b32.xlu1 %v352_v18, %s1079_s30 }
 0x596   :  { %v359_v19 = vpop.permute.xlu1 %358 }
 0x597   :  { %955 = vmatmul.mubr.msk.bf16.vlgmr.msra.gmra.mrb[8].mxu0 %vm69_vm1, %v359_v19 }
 0x598   :  { %967 = vmatpush3.bf16.msra.mxu0 %v1121_v4  ;;  %970 = vmatprep.mubr.msk.bf16.mxu0 %vm1076_vm0, %v1075_v1 }
 0x599   :  { %968 = vmatprep.subr.bf16.mxu0 %v1075_v1 }
 0x59c   :  { %969 = vmatpush3.bf16.msra.mxu0 %v1130_v6 }
 0x59d   :  { %982 = vmatprep.subr.bf16.mxu0 %v1075_v1 }
 0x66a   :  { %v397_v21 = vpop.f32.mrb[8].mxu0 }
 0x66b   :  { %v404_v22 = vadd.f32 %v403_v42, %v397_v21  ;;  %v956_v23 = vpop.f32.mrb[9].mxu0 }
 0x66c   :  { %v400_v24 = vpop.f32.mrb[10].mxu0 }
 0x66d   :  { %1027 = vtanh.f32 %v404_v22  ;;  %v957_v25 = vpop.f32.mrb[11].mxu0  ;;  %v870_v30 = vmul.f32 -1.442695, %v404_v22 }
 0x66f   :  { %1029 = vpow2.f32 %v870_v30 }
 0x677   :  { %v1028_v28 = vpop.eup %1027 }
 0x678   :  { %414 = vrot.lane.b32.xlu0 %v1028_v28, %s1078_s2 }
 0x679   :  { %v1030_v33 = vpop.eup %1029 }
 0x67a   :  { %v408_v34 = vadd.f32 1.0, %v1030_v33 }
 0x67c   :  { %1031 = vrcp.f32 %v408_v34 }
 0x686   :  { %v1032_v39 = vpop.eup %1031 }
 0x687   :  { %v412_v45 = vmul.f32 %v1032_v39, %v337_v12 }
 0x6ea   :  { %v415_v41 = vpop.permute.xlu0 %414 }
 0x6eb   :  { %v417_v44 = vmul.f32 %v1032_v39, %v415_v41 }
 0x6ed   :  { %419 = vrot.lane.b32.xlu1 %v417_v44, %s1078_s2 }
 0x75f   :  { %v420_v46 = vpop.permute.xlu1 %419 }
 0x760   :  { %v422_v42 = vadd.f32 %v420_v46, %v412_v45 }
 0x762   :  { %1033 = vtanh.f32 %v422_v42 }
 0x76c   :  { %v1034_v47 = vpop.eup %1033 }
 0x76d   :  { %425 = vrot.lane.b32.xlu0 %v1034_v47, %s1078_s2 }
 0x7df   :  { %v426_v48 = vpop.permute.xlu0 %425 }
 0x7e0   :  { %v1250_v49 = vmul.f32 %v1032_v39, %v426_v48 }
 0x7e2   :  { %v437_v50 = vpack.c.bf16 %v1250_v49, %v1250_v49 }
 0x7e4   :  { %443 = vrot.lane.b32.xlu1 %v437_v50, %s1079_s30 }
 0x856   :  { %v444_v51 = vpop.permute.xlu1 %443 }
 0x857   :  { %963 = vmatmul.mubr.msk.bf16.vlgmr.msra.gmra.mrb[8].mxu1 %vm69_vm1, %v444_v51 }
 0x858   :  { %975 = vmatpush3.bf16.msra.mxu1 %v1121_v4  ;;  %978 = vmatprep.mubr.msk.bf16.mxu1 %vm1076_vm0, %v1075_v1 }
 0x859   :  { %976 = vmatprep.subr.bf16.mxu1 %v1075_v1 }
 0x85c   :  { %977 = vmatpush3.bf16.msra.mxu1 %v1130_v6 }
 0x85d   :  { %990 = vmatprep.subr.bf16.mxu1 %v1075_v1 }
 0x92a   :  { %v482_v52 = vpop.f32.mrb[8].mxu1 }
 0x92b   :  { %v489_v53 = vadd.f32 %v488_v37, %v482_v52  ;;  %v964_v54 = vpop.f32.mrb[9].mxu1 }
 0x92c   :  { %v485_v55 = vpop.f32.mrb[10].mxu1 }
 0x92d   :  { %1035 = vtanh.f32 %v489_v53  ;;  %v965_v57 = vpop.f32.mrb[11].mxu1  ;;  %v874_v59 = vmul.f32 -1.442695, %v489_v53 }
 0x92f   :  { %1037 = vpow2.f32 %v874_v59 }
 0x937   :  { %v1036_v58 = vpop.eup %1035 }
 0x938   :  { %499 = vrot.lane.b32.xlu0 %v1036_v58, %s1078_s2 }
 0x939   :  { %v1038_v60 = vpop.eup %1037 }
 0x93a   :  { %v493_v61 = vadd.f32 1.0, %v1038_v60 }
 0x93c   :  { %1039 = vrcp.f32 %v493_v61 }
 0x946   :  { %v1040_v62 = vpop.eup %1039 }
 0x947   :  { %v497_v2 = vmul.f32 %v1040_v62, %v422_v42 }
 0x9aa   :  { %v500_v63 = vpop.permute.xlu0 %499 }
 0x9ab   :  { %v502_v0 = vmul.f32 %v1040_v62, %v500_v63 }
 0x9ad   :  { %504 = vrot.lane.b32.xlu1 %v502_v0, %s1078_s2 }
 0xa1f   :  { %v505_v3 = vpop.permute.xlu1 %504 }
 0xa20   :  { %v507_v37 = vadd.f32 %v505_v3, %v497_v2 }
 0xa22   :  { %1041 = vtanh.f32 %v507_v37 }
 0xa2c   :  { %v1042_v5 = vpop.eup %1041 }
 0xa2d   :  { %510 = vrot.lane.b32.xlu0 %v1042_v5, %s1078_s2 }
 0xa9f   :  { %v511_v7 = vpop.permute.xlu0 %510 }
 0xaa0   :  { %v1270_v8 = vmul.f32 %v1040_v62, %v511_v7 }
 0xaa2   :  { %v522_v9 = vpack.c.bf16 %v1270_v8, %v1270_v8 }
 0xaa4   :  { %526 = vrot.lane.b32.xlu1 %v522_v9, %s1079_s30 }
 0xb16   :  { %v527_v10 = vpop.permute.xlu1 %526 }
 0xb17   :  { %971 = vmatmul.mubr.msk.bf16.vlgmr.msra.gmra.mrb[12].mxu0 %vm69_vm1, %v527_v10 }
 0xb18   :  { %983 = vmatpush3.bf16.msra.mxu0 %v1121_v4  ;;  %986 = vmatprep.mubr.msk.bf16.mxu0 %vm1076_vm0, %v1075_v1 }
 0xb19   :  { %984 = vmatprep.subr.bf16.mxu0 %v1075_v1 }
 0xb1c   :  { %985 = vmatpush3.bf16.msra.mxu0 %v1130_v6 }
 0xbea   :  { %v565_v11 = vpop.f32.mrb[12].mxu0 }
 0xbeb   :  { %v572_v12 = vadd.f32 %v571_v38, %v565_v11  ;;  %v972_v13 = vpop.f32.mrb[13].mxu0 }
 0xbec   :  { %v568_v15 = vpop.f32.mrb[14].mxu0 }
 0xbed   :  { %1043 = vtanh.f32 %v572_v12  ;;  %v973_v18 = vpop.f32.mrb[15].mxu0  ;;  %v878_v21 = vmul.f32 -1.442695, %v572_v12 }
 0xbef   :  { %1045 = vpow2.f32 %v878_v21 }
 0xbf7   :  { %v1044_v19 = vpop.eup %1043 }
 0xbf8   :  { %582 = vrot.lane.b32.xlu0 %v1044_v19, %s1078_s2 }
 0xbf9   :  { %v1046_v22 = vpop.eup %1045 }
 0xbfa   :  { %v576_v23 = vadd.f32 1.0, %v1046_v22 }
 0xbfc   :  { %1047 = vrcp.f32 %v576_v23 }
 0xc06   :  { %v1048_v24 = vpop.eup %1047 }
 0xc07   :  { %v580_v30 = vmul.f32 %v1048_v24, %v507_v37 }
 0xc6a   :  { %v583_v25 = vpop.permute.xlu0 %582 }
 0xc6b   :  { %v585_v28 = vmul.f32 %v1048_v24, %v583_v25 }
 0xc6d   :  { %587 = vrot.lane.b32.xlu1 %v585_v28, %s1078_s2 }
 0xcdf   :  { %v588_v17 = vpop.permute.xlu1 %587 }
 0xce0   :  { %v590_v29 = vadd.f32 %v588_v17, %v580_v30 }
 0xce2   :  { %1049 = vtanh.f32 %v590_v29 }
 0xcec   :  { %v1050_v38 = vpop.eup %1049 }
 0xced   :  { %593 = vrot.lane.b32.xlu0 %v1050_v38, %s1078_s2 }
 0xd5f   :  { %v594_v33 = vpop.permute.xlu0 %593 }
 0xd60   :  { %v1289_v34 = vmul.f32 %v1048_v24, %v594_v33 }
 0xd62   :  { %v603_v39 = vpack.c.bf16 %v1289_v34, %v1289_v34 }
 0xd64   :  { %607 = vrot.lane.b32.xlu1 %v603_v39, %s1079_s30 }
 0xdd6   :  { %v608_v41 = vpop.permute.xlu1 %607 }
 0xdd7   :  { %979 = vmatmul.mubr.msk.bf16.vlgmr.msra.gmra.mrb[12].mxu1 %vm69_vm1, %v608_v41 }
 0xdd8   :  { %991 = vmatpush3.bf16.msra.mxu1 %v1121_v4  ;;  %994 = vmatprep.mubr.msk.bf16.mxu1 %vm1076_vm0, %v1075_v1 }
 0xdd9   :  { %992 = vmatprep.subr.bf16.mxu1 %v1075_v1 }
 0xddc   :  { %993 = vmatpush3.bf16.msra.mxu1 %v1130_v6 }
 0xeaa   :  { %v646_v44 = vpop.f32.mrb[12].mxu1 }
 0xeab   :  { %v653_v45 = vadd.f32 %v652_v43, %v646_v44  ;;  %v980_v46 = vpop.f32.mrb[13].mxu1 }
 0xeac   :  { %v649_v42 = vpop.f32.mrb[14].mxu1 }
 0xead   :  { %1051 = vtanh.f32 %v653_v45  ;;  %v981_v47 = vpop.f32.mrb[15].mxu1  ;;  %v882_v4 = vmul.f32 -1.442695, %v653_v45 }
 0xeaf   :  { %1053 = vpow2.f32 %v882_v4 }
 0xeb7   :  { %v1052_v48 = vpop.eup %1051 }
 0xeb8   :  { %663 = vrot.lane.b32.xlu0 %v1052_v48, %s1078_s2 }
 0xeb9   :  { %v1054_v50 = vpop.eup %1053 }
 0xeba   :  { %v657_v1 = vadd.f32 1.0, %v1054_v50 }
 0xebc   :  { %1055 = vrcp.f32 %v657_v1 }
 0xec6   :  { %v1056_v6 = vpop.eup %1055 }
 0xec7   :  { %v661_v53 = vmul.f32 %v1056_v6, %v590_v29 }
 0xf2a   :  { %v664_v51 = vpop.permute.xlu0 %663 }
 0xf2b   :  { %v666_v52 = vmul.f32 %v1056_v6, %v664_v51 }
 0xf2d   :  { %668 = vrot.lane.b32.xlu1 %v666_v52, %s1078_s2 }
 0xf9f   :  { %v669_v14 = vpop.permute.xlu1 %668 }
 0xfa0   :  { %v671_v36 = vadd.f32 %v669_v14, %v661_v53 }
 0xfa2   :  { %1057 = vtanh.f32 %v671_v36 }
 0xfac   :  { %v1058_v43 = vpop.eup %1057 }
 0xfad   :  { %674 = vrot.lane.b32.xlu0 %v1058_v43, %s1078_s2 }
0x101f   :  { %v675_v54 = vpop.permute.xlu0 %674 }
0x1020   :  { %v1308_v55 = vmul.f32 %v1056_v6, %v675_v54 }
0x1022   :  { %v684_v57 = vpack.c.bf16 %v1308_v55, %v1308_v55 }
0x1024   :  { %688 = vrot.lane.b32.xlu1 %v684_v57, %s1079_s30 }
0x1096   :  { %v689_v58 = vpop.permute.xlu1 %688 }
0x1097   :  { %987 = vmatmul.mubr.msk.bf16.vlgmr.msra.gmra.mrb[16].mxu0 %vm69_vm1, %v689_v58 }
0x116a   :  { %v727_v59 = vpop.f32.mrb[16].mxu0 }
0x116b   :  { %v734_v60 = vadd.f32 %v733_v35, %v727_v59  ;;  %v988_v61 = vpop.f32.mrb[17].mxu0 }
0x116c   :  { %v730_v62 = vpop.f32.mrb[18].mxu0 }
0x116d   :  { %1059 = vtanh.f32 %v734_v60  ;;  %v989_v63 = vpop.f32.mrb[19].mxu0  ;;  %v886_v2 = vmul.f32 -1.442695, %v734_v60 }
0x116f   :  { %1061 = vpow2.f32 %v886_v2 }
0x1177   :  { %v1060_v0 = vpop.eup %1059 }
0x1178   :  { %744 = vrot.lane.b32.xlu0 %v1060_v0, %s1078_s2 }
0x1179   :  { %v1062_v3 = vpop.eup %1061 }
0x117a   :  { %v738_v37 = vadd.f32 1.0, %v1062_v3 }
0x117c   :  { %1063 = vrcp.f32 %v738_v37 }
0x1186   :  { %v1064_v5 = vpop.eup %1063 }
0x1187   :  { %v742_v10 = vmul.f32 %v1064_v5, %v671_v36 }
0x11ea   :  { %v745_v7 = vpop.permute.xlu0 %744 }
0x11eb   :  { %v747_v9 = vmul.f32 %v1064_v5, %v745_v7 }
0x11ed   :  { %749 = vrot.lane.b32.xlu1 %v747_v9, %s1078_s2 }
0x125f   :  { %v750_v20 = vpop.permute.xlu1 %749 }
0x1260   :  { %v752_v27 = vadd.f32 %v750_v20, %v742_v10 }
0x1262   :  { %1065 = vtanh.f32 %v752_v27 }
0x126c   :  { %v1066_v35 = vpop.eup %1065 }
0x126d   :  { %755 = vrot.lane.b32.xlu0 %v1066_v35, %s1078_s2 }
0x12df   :  { %v756_v11 = vpop.permute.xlu0 %755 }
0x12e0   :  { %v758_v12 = vmul.f32 %v1064_v5, %v756_v11 }
0x12e2   :  { %v765_v13 = vpack.c.bf16 %v758_v12, %v758_v12 }
0x12e4   :  { %769 = vrot.lane.b32.xlu1 %v765_v13, %s1079_s30 }
0x1356   :  { %v770_v15 = vpop.permute.xlu1 %769 }
0x1357   :  { %995 = vmatmul.mubr.msk.bf16.vlgmr.msra.gmra.mrb[16].mxu1 %vm69_vm1, %v770_v15 }
0x142a   :  { %v808_v18 = vpop.f32.mrb[16].mxu1 }
0x142b   :  { %v815_v19 = vadd.f32 %v814_v40, %v808_v18  ;;  %v996_v21 = vpop.f32.mrb[17].mxu1 }
0x142c   :  { %v811_v22 = vpop.f32.mrb[18].mxu1 }
0x142d   :  { %1067 = vtanh.f32 %v815_v19  ;;  %v997_v23 = vpop.f32.mrb[19].mxu1  ;;  %v890_v25 = vmul.f32 -1.442695, %v815_v19 }
0x142f   :  { %1069 = vpow2.f32 %v890_v25 }
0x1437   :  { %v1068_v24 = vpop.eup %1067 }
0x1438   :  { %825 = vrot.lane.b32.xlu0 %v1068_v24, %s1078_s2 }
0x1439   :  { %v1070_v28 = vpop.eup %1069 }
0x143a   :  { %v819_v30 = vadd.f32 1.0, %v1070_v28 }
0x143c   :  { %1071 = vrcp.f32 %v819_v30 }
0x1446   :  { %v1072_v17 = vpop.eup %1071 }
0x1447   :  { %v823_v26 = vmul.f32 %v1072_v17, %v752_v27 }
0x14aa   :  { %v826_v29 = vpop.permute.xlu0 %825 }
0x14ab   :  { %v828_v38 = vmul.f32 %v1072_v17, %v826_v29 }
0x14ad   :  { %830 = vrot.lane.b32.xlu1 %v828_v38, %s1078_s2 }
0x14b1   :  { %259 = vrot.lane.b32.xlu1 %v1215_v56, %s1079_s30 }
0x14b5   :  { %430 = vrot.lane.b32.xlu1 %v1250_v49, %s1079_s30 }
0x14b9   :  { %598 = vrot.lane.b32.xlu1 %v1289_v34, %s1079_s30 }
0x14bd   :  { %760 = vrot.lane.b32.xlu1 %v758_v12, %s1079_s30 }
0x151f   :  { %v831_v31 = vpop.permute.xlu1 %830 }
0x1520   :  { %v833_v32 = vadd.f32 %v831_v31, %v823_v26 }
0x1522   :  { %1073 = vtanh.f32 %v833_v32 }
0x1523   :  { %v260_v40 = vpop.permute.xlu1 %259 }
0x1524   :  { %263 = vst.msk [vmem:[%s1414_s4] sm:$0xff] %vm262_vm3, %v260_v40 }
0x1525   :  { %864 = vst.msk [vmem:[%s1414_s4 + $0x38] sm:$0xff] %vm265_vm4, %v260_v40 }
0x1527   :  { %v431_v56 = vpop.permute.xlu1 %430 }
0x1528   :  { %871 = vst.msk [vmem:[%s1414_s4 + $0x10] sm:$0xff] %vm262_vm3, %v431_v56 }
0x1529   :  { %872 = vst.msk [vmem:[%s1414_s4 + $0x28] sm:$0xff] %vm265_vm4, %v431_v56 }
0x152b   :  { %v599_v33 = vpop.permute.xlu1 %598 }
0x152c   :  { %v1074_v49 = vpop.eup %1073 }
0x152d   :  { %836 = vrot.lane.b32.xlu0 %v1074_v49, %s1078_s2 }
0x152f   :  { %v761_v44 = vpop.permute.xlu1 %760 }
0x1531   :  { %345 = vrot.lane.b32.xlu0 %v1230_v16, %s1079_s30 }
0x1535   :  { %515 = vrot.lane.b32.xlu0 %v1270_v8, %s1079_s30 }
0x1539   :  { %679 = vrot.lane.b32.xlu0 %v1308_v55, %s1079_s30 }
0x159f   :  { %v837_v34 = vpop.permute.xlu0 %836 }
0x15a0   :  { %v839_v39 = vmul.f32 %v1072_v17, %v837_v34 }
0x15a2   :  { %841 = vrot.lane.b32.xlu0 %v839_v39, %s1079_s30 }
0x15a3   :  { %v346_v41 = vpop.permute.xlu0 %345 }
0x15a4   :  { %867 = vst.msk [vmem:[%s1414_s4 + $0x8] sm:$0xff] %vm262_vm3, %v346_v41 }
0x15a5   :  { %868 = vst.msk [vmem:[%s1414_s4 + $0x30] sm:$0xff] %vm265_vm4, %v346_v41  ;;  %888 = vst.msk [vmem:[%s1414_s4 + $0x8] sm:$0xff] %vm265_vm4, %v761_v44 }
0x15a6   :  { %887 = vst.msk [vmem:[%s1414_s4 + $0x30] sm:$0xff] %vm262_vm3, %v761_v44 }
0x15a7   :  { %v516_v16 = vpop.permute.xlu0 %515 }
0x15a8   :  { %875 = vst.msk [vmem:[%s1414_s4 + $0x18] sm:$0xff] %vm262_vm3, %v516_v16 }
0x15a9   :  { %876 = vst.msk [vmem:[%s1414_s4 + $0x20] sm:$0xff] %vm265_vm4, %v516_v16  ;;  %880 = vst.msk [vmem:[%s1414_s4 + $0x18] sm:$0xff] %vm265_vm4, %v599_v33 }
0x15aa   :  { %879 = vst.msk [vmem:[%s1414_s4 + $0x20] sm:$0xff] %vm262_vm3, %v599_v33 }
0x15ab   :  { %v680_v8 = vpop.permute.xlu0 %679 }
0x15ac   :  { %883 = vst.msk [vmem:[%s1414_s4 + $0x28] sm:$0xff] %vm262_vm3, %v680_v8 }
0x15ad   :  { %884 = vst.msk [vmem:[%s1414_s4 + $0x10] sm:$0xff] %vm265_vm4, %v680_v8 }
0x1614   :  { %v842_v45 = vpop.permute.xlu0 %841 }
0x1615   :  { %891 = vst.msk [vmem:[%s1414_s4 + $0x38] sm:$0xff] %vm262_vm3, %v842_v45 }
0x1616   :  { %845 = vst.msk [vmem:[%s1414_s4] sm:$0xff] %vm265_vm4, %v842_v45 }

</bundles_post_ra>
